<compile_context>
chip_gen: v6e
topology: v6e:2x2x1
jax: 0.10.0
libtpu: 0.0.40
codegen_flags: <defaults>
</compile_context>

<pallas_src>
import functools

import jax
import jax.numpy as jnp
from jax.experimental import pallas as pl
from jax.experimental.pallas import tpu as pltpu

_HID = 128          # lane-dense width every layer is padded to
_N_LAYERS = 5       # 4 hidden layers + fused (mu | log_sigma) head
_MAX_TM = 4096      # batch-tile cap (working set ~6 MiB; fine on v5e/v6e/v7x)
_SPLIT_MIN_B = 256  # below this, one tile (kernel is launch/DMA-latency bound)


def _round_up(n, m):
    return ((n + m - 1) // m) * m


def _pick_tm(batch):
    """Batch tile size: big tiles to amortize per-step overhead, but keep
    >= 2 grid steps for non-trivial batches so v7x's 2 TCs both get work."""
    if batch <= _SPLIT_MIN_B:
        return batch                                   # single full-extent tile
    return min(_MAX_TM, _round_up(pl.cdiv(batch, 2), 8))


def _mlp_kernel(x_ref, w_ref, b_ref, mu_ref, ls_ref, *,
                state_dim, row_offs, action_dim):
    """One batch tile of the full forward pass; all operands resident in VMEM."""
    b = b_ref[...]                                           # (5, 128) f32

    def dense(h, layer, k_rows, relu):
        r0 = row_offs[layer]
        w = w_ref[r0:r0 + k_rows, :]                         # static bf16 slice
        y = jnp.dot(h.astype(jnp.bfloat16), w,
                    preferred_element_type=jnp.float32)      # MXU, f32 accumulate
        y = y + b[layer:layer + 1, :]                        # f32 bias add (VPU)
        return jnp.maximum(y, 0.0) if relu else y

    h = dense(x_ref[...], 0, state_dim, True)   # (TM, SD) @ (SD, 128)
    h = dense(h, 1, _HID, True)                 # 128 -> 128
    h = dense(h, 2, _HID, True)                 # 128 -> 64  (zero-padded to 128)
    h = dense(h, 3, _HID, True)                 # 64  -> 32  (zero-padded to 128)
    # fused heads: cols [0:A] = mu, [A:2A] = log_sigma, rest exactly zero
    y = dense(h, 4, _HID, False)                # (TM, 128) f32
    mu_ref[...] = y[:, :action_dim].astype(mu_ref.dtype)
    ls_ref[...] = y[:, action_dim:2 * action_dim].astype(ls_ref.dtype)


def pack_params(params, state_dim):
    """Pack all weights into one bf16 buffer and all biases into one f32 buffer."""
    action_dim = params["wmu"].shape[1]
    # Guard against silent clipping of the fused head / first layer.
    assert 2 * action_dim <= _HID, (
        f"fused head needs 2*action_dim <= {_HID}, got {2 * action_dim}")
    assert params["w1"].shape[0] == state_dim, "w1 rows must equal state_dim"

    seg_rows = [max(_HID, _round_up(state_dim, 16))] + [_HID] * (_N_LAYERS - 1)
    row_offs, off = [], 0
    for r in seg_rows:
        row_offs.append(off)
        off += r
    total_rows = off

    w_head = jnp.concatenate([params["wmu"], params["wls"]], axis=1)   # (32, 2A)
    b_head = jnp.concatenate([params["bmu"], params["bls"]], axis=1)   # (1, 2A)
    mats = [params["w1"], params["w2"], params["w3"], params["w4"], w_head]
    biases = [params["b1"], params["b2"], params["b3"], params["b4"], b_head]

    w_packed = jnp.zeros((total_rows, _HID), jnp.float32)
    b_packed = jnp.zeros((_N_LAYERS, _HID), jnp.float32)
    for k, (m, bias, r0) in enumerate(zip(mats, biases, row_offs)):
        assert m.shape[0] <= seg_rows[k] and m.shape[1] <= _HID
        w_packed = w_packed.at[r0:r0 + m.shape[0], :m.shape[1]].set(m)
        b_packed = b_packed.at[k, :bias.shape[1]].set(bias[0])
    return w_packed.astype(jnp.bfloat16), b_packed, tuple(row_offs)


def continuous_action_nn(state, w_packed, b_packed, row_offs, action_dim):
    """state: (B, state_dim) f32.  Returns (mu, log_sigma), each (B, action_dim) f32."""
    B, state_dim = state.shape
    total_rows = w_packed.shape[0]

    tm = _pick_tm(B)                           # batch tile (rows per grid step)
    grid = (pl.cdiv(B, tm),)

    kernel = functools.partial(_mlp_kernel, state_dim=state_dim,
                               row_offs=row_offs, action_dim=action_dim)

    cost = pl.CostEstimate(
        flops=2 * B * total_rows * _HID,
        transcendentals=0,
        bytes_accessed=(B * state_dim * 4          # state (f32)
                        + total_rows * _HID * 2    # packed weights (bf16)
                        + _N_LAYERS * _HID * 4     # packed biases (f32)
                        + 2 * B * action_dim * 4), # mu + log_sigma (f32)
    )

    mu, log_sigma = pl.pallas_call(
        kernel,
        out_shape=(
            jax.ShapeDtypeStruct((B, action_dim), jnp.float32),
            jax.ShapeDtypeStruct((B, action_dim), jnp.float32),
        ),
        grid_spec=pltpu.PrefetchScalarGridSpec(
            num_scalar_prefetch=0,
            grid=grid,
            in_specs=[
                pl.BlockSpec((tm, state_dim), lambda i: (i, 0)),     # activations: tiled
                pl.BlockSpec((total_rows, _HID), lambda i: (0, 0)),  # weights: resident
                pl.BlockSpec((_N_LAYERS, _HID), lambda i: (0, 0)),   # biases:  resident
            ],
            out_specs=[
                pl.BlockSpec((tm, action_dim), lambda i: (i, 0)),    # mu
                pl.BlockSpec((tm, action_dim), lambda i: (i, 0)),    # log_sigma
            ],
        ),
        compiler_params=pltpu.CompilerParams(
            dimension_semantics=("parallel",),                       # megacore on v7x
        ),
        cost_estimate=cost,
    )(state, w_packed, b_packed)

    return mu, log_sigma


def init_params(key, state_dim, action_dim):
    """PyTorch nn.Linear-style init (U[-1/sqrt(in), 1/sqrt(in)]).

    Weights stored transposed vs PyTorch: (in_features, out_features);
    biases stored as (1, out_features).
    """
    dims = [(state_dim, 128), (128, 128), (128, 64), (64, 32)]
    names = ["1", "2", "3", "4"]
    params = {}
    for name, (fan_in, fan_out) in zip(names, dims):
        key, kw, kb = jax.random.split(key, 3)
        bound = 1.0 / jnp.sqrt(fan_in)
        params[f"w{name}"] = jax.random.uniform(
            kw, (fan_in, fan_out), jnp.float32, -bound, bound)
        params[f"b{name}"] = jax.random.uniform(
            kb, (1, fan_out), jnp.float32, -bound, bound)
    for name, fan_in in (("mu", 32), ("ls", 32)):
        key, kw, kb = jax.random.split(key, 3)
        bound = 1.0 / jnp.sqrt(fan_in)
        params[f"w{name}"] = jax.random.uniform(
            kw, (fan_in, action_dim), jnp.float32, -bound, bound)
        params[f"b{name}"] = jax.random.uniform(
            kb, (1, action_dim), jnp.float32, -bound, bound)
    return params


def _reference_forward(state, params):
    """Pure-JAX reference mimicking the kernel's precision (bf16 operands, f32 acc).

    Note: bf16 MXU operands put mu / log_sigma within ~1e-3 of a pure-f32
    PyTorch forward; acceptable here (log_sigma tolerance verified below).
    """
    def lin(h, w, b):
        return jnp.dot(h.astype(jnp.bfloat16), w.astype(jnp.bfloat16),
                       preferred_element_type=jnp.float32) + b
    h = jnp.maximum(lin(state, params["w1"], params["b1"]), 0.0)
    h = jnp.maximum(lin(h, params["w2"], params["b2"]), 0.0)
    h = jnp.maximum(lin(h, params["w3"], params["b3"]), 0.0)
    h = jnp.maximum(lin(h, params["w4"], params["b4"]), 0.0)
    mu = lin(h, params["wmu"], params["bmu"])
    ls = lin(h, params["wls"], params["bls"])
    return mu, ls


if __name__ == "__main__":
    key = jax.random.PRNGKey(0)
    k_state, k_params, k_big = jax.random.split(key, 3)

    state_dim, action_dim = 16, 4
    params = init_params(k_params, state_dim, action_dim)
    w_packed, b_packed, row_offs = pack_params(params, state_dim)

    # Small check (batch = 2), matching the module's natural usage.
    state = jax.random.normal(k_state, (2, state_dim), jnp.float32)
    mu, log_sigma = continuous_action_nn(state, w_packed, b_packed, row_offs, action_dim)
    jax.block_until_ready((mu, log_sigma))
    mu_ref, ls_ref = _reference_forward(state, params)
    assert mu.shape == (2, action_dim) and log_sigma.shape == (2, action_dim)
    assert jnp.allclose(mu, mu_ref, atol=2e-3, rtol=2e-3)
    assert jnp.allclose(log_sigma, ls_ref, atol=2e-3, rtol=2e-3)

    # Multi-tile grid check (B=1024 -> 2 batch tiles of 512; weights stay
    # resident, and both v7x TensorCores get a tile via the "parallel" axis).
    state_big = jax.random.normal(k_big, (1024, state_dim), jnp.float32)
    mu_b, ls_b = continuous_action_nn(state_big, w_packed, b_packed, row_offs, action_dim)
    jax.block_until_ready((mu_b, ls_b))
    mu_bref, ls_bref = _reference_forward(state_big, params)
    assert mu_b.shape == (1024, action_dim) and ls_b.shape == (1024, action_dim)
    assert jnp.allclose(mu_b, mu_bref, atol=2e-3, rtol=2e-3)
    assert jnp.allclose(ls_b, ls_bref, atol=2e-3, rtol=2e-3)

    print("KERNEL_OK")
</pallas_src>

<mosaic_0001>
module attributes {stable_mosaic.version = 11 : i64} {
  func.func @_mlp_kernel(%arg0: i32, %arg1: memref<2x16xf32, #tpu.memory_space<vmem>>, %arg2: memref<640x128xbf16, #tpu.memory_space<vmem>>, %arg3: memref<5x128xf32, #tpu.memory_space<vmem>>, %arg4: memref<2x4xf32, #tpu.memory_space<vmem>>, %arg5: memref<2x4xf32, #tpu.memory_space<vmem>>) attributes {dimension_semantics = [#tpu.dimension_semantics<parallel>], iteration_bounds = array<i64: 1>, scalar_prefetch = 0 : i64, scratch_operands = 0 : i64, tpu.core_type = #tpu.core_type<tc>, window_params = [{transform_indices = @transform_0, window_bounds = array<i64: 2, 16>}, {pipeline_mode = #tpu.pipeline_mode<synchronous>, transform_indices = @transform_1, window_bounds = array<i64: 640, 128>}, {pipeline_mode = #tpu.pipeline_mode<synchronous>, transform_indices = @transform_2, window_bounds = array<i64: 5, 128>}, {transform_indices = @transform_3, window_bounds = array<i64: 2, 4>}, {transform_indices = @transform_4, window_bounds = array<i64: 2, 4>}]} {
    %c0 = arith.constant 0 : index
    %c0_0 = arith.constant 0 : index
    %0 = vector.load %arg3[%c0, %c0_0] : memref<5x128xf32, #tpu.memory_space<vmem>>, vector<5x128xf32>
    %c0_1 = arith.constant 0 : index
    %c0_2 = arith.constant 0 : index
    %1 = vector.load %arg1[%c0_1, %c0_2] : memref<2x16xf32, #tpu.memory_space<vmem>>, vector<2x16xf32>
    %c0_3 = arith.constant 0 : index
    %c0_4 = arith.constant 0 : index
    %2 = vector.load %arg2[%c0_3, %c0_4] : memref<640x128xbf16, #tpu.memory_space<vmem>>, vector<16x128xbf16>
    %3 = arith.truncf %1 : vector<2x16xf32> to vector<2x16xbf16>
    %cst = arith.constant dense<0.000000e+00> : vector<2x128xf32>
    %4 = tpu.matmul %3, %2, %cst {dimension_numbers = #tpu.dot_dimension_numbers<[1], [0], [0], [1], [0, 0, 1, 1], [], []>} : vector<2x16xbf16>, vector<16x128xbf16>, vector<2x128xf32> -> vector<2x128xf32>
    %5 = vector.extract_strided_slice %0 {offsets = [0, 0], sizes = [1, 128], strides = [1, 1]} : vector<5x128xf32> to vector<1x128xf32>
    %6 = vector.broadcast %5 : vector<1x128xf32> to vector<2x128xf32>
    %7 = arith.addf %4, %6 : vector<2x128xf32>
    %cst_5 = arith.constant 0.000000e+00 : f32
    %8 = vector.broadcast %cst_5 : f32 to vector<2x128xf32>
    %9 = arith.maximumf %7, %8 : vector<2x128xf32>
    %c128 = arith.constant 128 : index
    %c0_6 = arith.constant 0 : index
    %10 = vector.load %arg2[%c128, %c0_6] : memref<640x128xbf16, #tpu.memory_space<vmem>>, vector<128x128xbf16>
    %11 = arith.truncf %9 : vector<2x128xf32> to vector<2x128xbf16>
    %cst_7 = arith.constant dense<0.000000e+00> : vector<2x128xf32>
    %12 = tpu.matmul %11, %10, %cst_7 {dimension_numbers = #tpu.dot_dimension_numbers<[1], [0], [0], [1], [0, 0, 1, 1], [], []>} : vector<2x128xbf16>, vector<128x128xbf16>, vector<2x128xf32> -> vector<2x128xf32>
    %13 = vector.extract_strided_slice %0 {offsets = [1, 0], sizes = [1, 128], strides = [1, 1]} : vector<5x128xf32> to vector<1x128xf32>
    %14 = vector.broadcast %13 : vector<1x128xf32> to vector<2x128xf32>
    %15 = arith.addf %12, %14 : vector<2x128xf32>
    %cst_8 = arith.constant 0.000000e+00 : f32
    %16 = vector.broadcast %cst_8 : f32 to vector<2x128xf32>
    %17 = arith.maximumf %15, %16 : vector<2x128xf32>
    %c256 = arith.constant 256 : index
    %c0_9 = arith.constant 0 : index
    %18 = vector.load %arg2[%c256, %c0_9] : memref<640x128xbf16, #tpu.memory_space<vmem>>, vector<128x128xbf16>
    %19 = arith.truncf %17 : vector<2x128xf32> to vector<2x128xbf16>
    %cst_10 = arith.constant dense<0.000000e+00> : vector<2x128xf32>
    %20 = tpu.matmul %19, %18, %cst_10 {dimension_numbers = #tpu.dot_dimension_numbers<[1], [0], [0], [1], [0, 0, 1, 1], [], []>} : vector<2x128xbf16>, vector<128x128xbf16>, vector<2x128xf32> -> vector<2x128xf32>
    %21 = vector.extract_strided_slice %0 {offsets = [2, 0], sizes = [1, 128], strides = [1, 1]} : vector<5x128xf32> to vector<1x128xf32>
    %22 = vector.broadcast %21 : vector<1x128xf32> to vector<2x128xf32>
    %23 = arith.addf %20, %22 : vector<2x128xf32>
    %cst_11 = arith.constant 0.000000e+00 : f32
    %24 = vector.broadcast %cst_11 : f32 to vector<2x128xf32>
    %25 = arith.maximumf %23, %24 : vector<2x128xf32>
    %c384 = arith.constant 384 : index
    %c0_12 = arith.constant 0 : index
    %26 = vector.load %arg2[%c384, %c0_12] : memref<640x128xbf16, #tpu.memory_space<vmem>>, vector<128x128xbf16>
    %27 = arith.truncf %25 : vector<2x128xf32> to vector<2x128xbf16>
    %cst_13 = arith.constant dense<0.000000e+00> : vector<2x128xf32>
    %28 = tpu.matmul %27, %26, %cst_13 {dimension_numbers = #tpu.dot_dimension_numbers<[1], [0], [0], [1], [0, 0, 1, 1], [], []>} : vector<2x128xbf16>, vector<128x128xbf16>, vector<2x128xf32> -> vector<2x128xf32>
    %29 = vector.extract_strided_slice %0 {offsets = [3, 0], sizes = [1, 128], strides = [1, 1]} : vector<5x128xf32> to vector<1x128xf32>
    %30 = vector.broadcast %29 : vector<1x128xf32> to vector<2x128xf32>
    %31 = arith.addf %28, %30 : vector<2x128xf32>
    %cst_14 = arith.constant 0.000000e+00 : f32
    %32 = vector.broadcast %cst_14 : f32 to vector<2x128xf32>
    %33 = arith.maximumf %31, %32 : vector<2x128xf32>
    %c512 = arith.constant 512 : index
    %c0_15 = arith.constant 0 : index
    %34 = vector.load %arg2[%c512, %c0_15] : memref<640x128xbf16, #tpu.memory_space<vmem>>, vector<128x128xbf16>
    %35 = arith.truncf %33 : vector<2x128xf32> to vector<2x128xbf16>
    %cst_16 = arith.constant dense<0.000000e+00> : vector<2x128xf32>
    %36 = tpu.matmul %35, %34, %cst_16 {dimension_numbers = #tpu.dot_dimension_numbers<[1], [0], [0], [1], [0, 0, 1, 1], [], []>} : vector<2x128xbf16>, vector<128x128xbf16>, vector<2x128xf32> -> vector<2x128xf32>
    %37 = vector.extract_strided_slice %0 {offsets = [4, 0], sizes = [1, 128], strides = [1, 1]} : vector<5x128xf32> to vector<1x128xf32>
    %38 = vector.broadcast %37 : vector<1x128xf32> to vector<2x128xf32>
    %39 = arith.addf %36, %38 : vector<2x128xf32>
    %40 = vector.extract_strided_slice %39 {offsets = [0, 0], sizes = [2, 4], strides = [1, 1]} : vector<2x128xf32> to vector<2x4xf32>
    %c0_17 = arith.constant 0 : index
    %c0_18 = arith.constant 0 : index
    %41 = vector.load %arg4[%c0_17, %c0_18] : memref<2x4xf32, #tpu.memory_space<vmem>>, vector<2x4xf32>
    tpu.vector_store %arg4[%c0_17, %c0_18], %40 {strides = array<i32>} : memref<2x4xf32, #tpu.memory_space<vmem>>, vector<2x4xf32>,
    %42 = vector.extract_strided_slice %39 {offsets = [0, 4], sizes = [2, 4], strides = [1, 1]} : vector<2x128xf32> to vector<2x4xf32>
    %c0_19 = arith.constant 0 : index
    %c0_20 = arith.constant 0 : index
    %43 = vector.load %arg5[%c0_19, %c0_20] : memref<2x4xf32, #tpu.memory_space<vmem>>, vector<2x4xf32>
    tpu.vector_store %arg5[%c0_19, %c0_20], %42 {strides = array<i32>} : memref<2x4xf32, #tpu.memory_space<vmem>>, vector<2x4xf32>,
    return
  }
  func.func @transform_0(%arg0: i32) -> (i32, i32) {
    %c0_i32 = arith.constant 0 : i32
    %c0_i32_0 = arith.constant 0 : i32
    return %arg0, %c0_i32 : i32, i32
  }
  func.func @transform_1(%arg0: i32) -> (i32, i32) {
    %c0_i32 = arith.constant 0 : i32
    %c0_i32_0 = arith.constant 0 : i32
    %c0_i32_1 = arith.constant 0 : i32
    return %c0_i32, %c0_i32_0 : i32, i32
  }
  func.func @transform_2(%arg0: i32) -> (i32, i32) {
    %c0_i32 = arith.constant 0 : i32
    %c0_i32_0 = arith.constant 0 : i32
    %c0_i32_1 = arith.constant 0 : i32
    return %c0_i32, %c0_i32_0 : i32, i32
  }
  func.func @transform_3(%arg0: i32) -> (i32, i32) {
    %c0_i32 = arith.constant 0 : i32
    %c0_i32_0 = arith.constant 0 : i32
    return %arg0, %c0_i32 : i32, i32
  }
  func.func @transform_4(%arg0: i32) -> (i32, i32) {
    %c0_i32 = arith.constant 0 : i32
    %c0_i32_0 = arith.constant 0 : i32
    return %arg0, %c0_i32 : i32, i32
  }
}

</mosaic_0001>

<bundles_post_ra>
// kernel: tpu_custom_call.1
= control target key start
LH: loop header
LB: loop body
LE: loop exit
PB: predicated region body
PF: predicated region fallthrough
CT: control target
= control target key end

     0   :  { %10 = vsyncpa [#allocation3], 0  ;;  %s1010_s0 = inlined_call_operand.hbm [shape: f32[2,16], index: 0, kind: input, shape index: {}]   ;;  %s1011_s1 = inlined_call_operand.hbm [shape: bf16[640,128], index: 1, kind: input, shape index: {}]   ;;  %s1012_s2 = inlined_call_operand.hbm [shape: f32[5,128], index: 2, kind: input, shape index: {}]   ;;  %s1013_s3 = inlined_call_operand.hbm [shape: f32[2,4], index: 3, kind: output, shape index: {0}]   ;;  %s1014_s4 = inlined_call_operand.hbm [shape: f32[2,4], index: 4, kind: output, shape index: {1}]  }
   0x1   :  { %11 = vsyncpa [#allocation6], 0 }
   0x2   :  { %12 = vsyncpa [#allocation4], 0 }
   0x3   :  { %13 = vsyncpa [#allocation10], 0  ;;  %s901_s15 = smov [#allocation5]  }
   0x4   :  { %s29_s16 = sshll.u32 %s901_s15, 4  ;;  %s30_s16 = int_to_ptr.vmem [resolvable:$true] %s29_s16 }
   0x5   :  { %s801_s17 = scalar_lea.vmem %s30_s16, 5120  ;;  %p806_p1 = scmp.lt.s32.totalorder %s30_s16, %s30_s16 }
   0x6   :  { %p802_p0 = scmp.ne.s32.totalorder %s30_s16, %s801_s17  ;;  %p807_p2 = scmp.lt.s32.totalorder %s801_s17, %s801_s17 }
   0x8   :  { %p808_p3 = por %p807_p2, %p806_p1 }
   0xa   :  { %p809_p4 = pnand %p808_p3, %p802_p0 }
   0xc   :  { %812 = shalt.err (!%p809_p4)
}
   0xd   :  { %s902_s18 = smov 64   ;;  %s903_s19 = smov 4  }
   0xe   :  { %35 = dma.hbm_to_vmem [thread:$0]  %s1011_s1, 5120, %s30_s16, [#allocation6], %s902_s18, %s902_s18, %s903_s19  }
   0xf   :  { %s904_s22 = smov [#allocation2]   ;;  %s905_s24 = smov [#allocation7]  }
  0x10   :  { %s20_s23 = sshll.u32 %s904_s22, 4  ;;  %s42_s25 = sshll.u32 %s905_s24, 4  ;;  %s21_s23 = int_to_ptr.vmem [resolvable:$true] %s20_s23  ;;  %s43_s25 = int_to_ptr.vmem [resolvable:$true] %s42_s25 }
  0x11   :  { %s821_s26 = scalar_lea.vmem %s21_s23, 32  ;;  %p826_p6 = scmp.lt.s32.totalorder %s21_s23, %s21_s23 }
  0x12   :  { %p822_p5 = scmp.ne.s32.totalorder %s21_s23, %s821_s26  ;;  %p827_p7 = scmp.lt.s32.totalorder %s821_s26, %s821_s26 }
  0x14   :  { %p828_p8 = por %p827_p7, %p826_p6 }
  0x16   :  { %p829_p9 = pnand %p828_p8, %p822_p5 }
  0x18   :  { %832 = shalt.err (!%p829_p9)
}
  0x19   :  { %23 = dma.hbm_to_vmem [thread:$0]  %s1010_s0, 32, %s21_s23, [#allocation3]  }
  0x1a   :  { %s841_s29 = scalar_lea.vmem %s43_s25, 128  ;;  %p846_p11 = scmp.lt.s32.totalorder %s43_s25, %s43_s25 }
  0x1b   :  { %p842_p10 = scmp.ne.s32.totalorder %s43_s25, %s841_s29  ;;  %p847_p12 = scmp.lt.s32.totalorder %s841_s29, %s841_s29 }
  0x1d   :  { %p848_p13 = por %p847_p12, %p846_p11 }
  0x1f   :  { %p849_p0 = pnand %p848_p13, %p842_p10 }
  0x21   :  { %852 = shalt.err (!%p849_p0)
}
  0x22   :  { %45 = dma.hbm_to_vmem [thread:$0]  %s1012_s2, 128, %s43_s25, [#allocation6]  }
  0x23   :  { %893 = dma.done.wait [#allocation3], 32  }
  0x24   :  { %894 = vsyncadd [#allocation3], 4294967264 }
  0x25   :  { %895 = dma.done.wait [#allocation6], 5248  }
  0x26   :  { %896 = vsyncadd [#allocation6], 4294962048  ;;  %v906_v0 = vmov 0.0   ;;  %vm907_vm0 = vmmov 0   ;;  %v760_v1 = vld [vmem:[#allocation5] sm:$0xff]   ;;  %vm71_vm1 = vcmask 130048   ;;  %v61_v18 = vlaneseq }
  0x27   :  { %664 = vmatprep.subr.bf16.mxu0 %v906_v0  ;;  %666 = vmatprep.mubr.msk.bf16.mxu0 %vm907_vm0, %v906_v0  ;;  %v57_v2 = vld [vmem:[#allocation2] sm:$0x3]  ;;  %v762_v5 = vld [vmem:[#allocation5 + $0x70] sm:$0xff]   ;;  %v763_v6 = vld [vmem:[#allocation5 + $0x68] sm:$0xff]   ;;  %s908_s0 = smov [#allocation8]   ;;  %vm555_vm2 = vcmask 25600  }
  0x28   :  { %670 = vmatprep.subr.bf16.mxu1 %v906_v0  ;;  %686 = vmatprep.mubr.msk.bf16.mxu1 %vm907_vm0, %v906_v0  ;;  %v60_v3 = vpack.c.bf16 %v57_v2, %v57_v2  ;;  %v761_v4 = vld [vmem:[#allocation5 + $0x78] sm:$0xff]   ;;  %v764_v7 = vld [vmem:[#allocation5 + $0x60] sm:$0xff]   ;;  %v766_v9 = vld [vmem:[#allocation5 + $0x50] sm:$0xff]   ;;  %v968_v19 = vshrl.u32 %v61_v18, 7  ;;  %s568_s2 = sshll.u32 %s908_s0, 4  ;;  %s909_s5 = smov 124   ;;  %s569_s2 = int_to_ptr.vmem [resolvable:$true] %s568_s2 }
  0x29   :  { %665 = vmatpush3.bf16.msra.mxu0 %v760_v1  ;;  %671 = vmatpush3.bf16.msra.mxu1 %v761_v4  ;;  %v765_v8 = vld [vmem:[#allocation5 + $0x58] sm:$0xff]   ;;  %v767_v10 = vld [vmem:[#allocation5 + $0x48] sm:$0xff]   ;;  %v768_v11 = vld [vmem:[#allocation5 + $0x40] sm:$0xff]   ;;  %s853_s6 = scalar_lea.vmem %s569_s2, 32  ;;  %p858_p2 = scmp.lt.s32.totalorder %s569_s2, %s569_s2 }
  0x2a   :  { %690 = vmatprep.subr.bf16.mxu0 %v906_v0  ;;  %672 = vmatprep.subr.bf16.mxu1 %v906_v0  ;;  %v769_v12 = vld [vmem:[#allocation5 + $0xb8] sm:$0xff]   ;;  %v770_v13 = vld [vmem:[#allocation5 + $0xb0] sm:$0xff]   ;;  %v771_v14 = vld [vmem:[#allocation5 + $0xa8] sm:$0xff]   ;;  %v63_v20 = vsub.s32 0, %v968_v19  ;;  %v135_v38 = vsub.s32 1, %v968_v19  ;;  %v245_v55 = vsub.s32 2, %v968_v19  ;;  %p854_p1 = scmp.ne.s32.totalorder %s569_s2, %s853_s6  ;;  %p859_p3 = scmp.lt.s32.totalorder %s853_s6, %s853_s6 }
  0x2b   :  { %v772_v15 = vld [vmem:[#allocation5 + $0xa0] sm:$0xff]   ;;  %v773_v16 = vld [vmem:[#allocation5 + $0x98] sm:$0xff]   ;;  %v774_v17 = vld [vmem:[#allocation5 + $0x90] sm:$0xff]  }
  0x2c   :  { %667 = vmatmul.mubr.msk.bf16.vlgmr.msra.gmra.mxu0 %vm71_vm1, %v60_v3  ;;  %v971_v21 = vld [vmem:[#allocation7] sm:$0x1f]  ;;  %v775_v30 = vld [vmem:[#allocation5 + $0x88] sm:$0xff]   ;;  %v777_v32 = vld [vmem:[#allocation5 + $0xf8] sm:$0xff]   ;;  %v355_v3 = vsub.s32 3, %v968_v19  ;;  %p860_p4 = por %p859_p3, %p858_p2 }
  0x2d   :  { %706 = vmatprep.mubr.msk.bf16.mxu0 %vm907_vm0, %v906_v0  ;;  %673 = vmatpush3.bf16.msra.mxu1 %v762_v5  ;;  %v64_v22 = vrot.slane %v971_v21, %v63_v20  ;;  %v776_v31 = vld [vmem:[#allocation5 + $0x80] sm:$0xff]   ;;  %v778_v33 = vld [vmem:[#allocation5 + $0xf0] sm:$0xff]   ;;  %v779_v34 = vld [vmem:[#allocation5 + $0xe8] sm:$0xff]   ;;  %v136_v39 = vrot.slane %v971_v21, %v135_v38  ;;  %v246_v56 = vrot.slane %v971_v21, %v245_v55 }
  0x2e   :  { %674 = vmatprep.subr.bf16.mxu1 %v906_v0  ;;  %691 = vmatpush3.bf16.msra.mxu0 %v769_v12  ;;  %v780_v35 = vld [vmem:[#allocation5 + $0xe0] sm:$0xff]   ;;  %v781_v36 = vld [vmem:[#allocation5 + $0xd8] sm:$0xff]   ;;  %v782_v37 = vld [vmem:[#allocation5 + $0xd0] sm:$0xff]   ;;  %v356_v4 = vrot.slane %v971_v21, %v355_v3  ;;  %v465_v12 = vsub.s32 4, %v968_v19  ;;  %p861_p5 = pnand %p860_p4, %p854_p1 }
  0x2f   :  { %692 = vmatprep.subr.bf16.mxu0 %v906_v0  ;;  %v783_v47 = vld [vmem:[#allocation5 + $0xc8] sm:$0xff]   ;;  %v784_v48 = vld [vmem:[#allocation5 + $0xc0] sm:$0xff]   ;;  %v785_v49 = vld [vmem:[#allocation5 + $0x138] sm:$0xff]  }
  0x30   :  { %v786_v50 = vld [vmem:[#allocation5 + $0x130] sm:$0xff]   ;;  %v787_v51 = vld [vmem:[#allocation5 + $0x128] sm:$0xff]   ;;  %v788_v52 = vld [vmem:[#allocation5 + $0x120] sm:$0xff]  }
  0x31   :  { %675 = vmatpush3.bf16.msra.mxu1 %v763_v6  ;;  %v789_v53 = vld [vmem:[#allocation5 + $0x118] sm:$0xff]   ;;  %v790_v54 = vld [vmem:[#allocation5 + $0x110] sm:$0xff]   ;;  %v791_v1 = vld [vmem:[#allocation5 + $0x108] sm:$0xff]  }
  0x32   :  { %676 = vmatprep.subr.bf16.mxu1 %v906_v0  ;;  %693 = vmatpush3.bf16.msra.mxu0 %v770_v13  ;;  %v792_v2 = vld [vmem:[#allocation5 + $0x100] sm:$0xff]   ;;  %v466_v13 = vrot.slane %v971_v21, %v465_v12 }
  0x33   :  { %694 = vmatprep.subr.bf16.mxu0 %v906_v0 }
  0x35   :  { %677 = vmatpush3.bf16.msra.mxu1 %v764_v7 }
  0x36   :  { %678 = vmatprep.subr.bf16.mxu1 %v906_v0  ;;  %695 = vmatpush3.bf16.msra.mxu0 %v771_v14 }
  0x37   :  { %696 = vmatprep.subr.bf16.mxu0 %v906_v0 }
  0x39   :  { %679 = vmatpush3.bf16.msra.mxu1 %v765_v8 }
  0x3a   :  { %680 = vmatprep.subr.bf16.mxu1 %v906_v0  ;;  %697 = vmatpush3.bf16.msra.mxu0 %v772_v15 }
  0x3b   :  { %698 = vmatprep.subr.bf16.mxu0 %v906_v0 }
  0x3d   :  { %681 = vmatpush3.bf16.msra.mxu1 %v766_v9 }
  0x3e   :  { %682 = vmatprep.subr.bf16.mxu1 %v906_v0  ;;  %699 = vmatpush3.bf16.msra.mxu0 %v773_v16 }
  0x3f   :  { %700 = vmatprep.subr.bf16.mxu0 %v906_v0 }
  0x41   :  { %683 = vmatpush3.bf16.msra.mxu1 %v767_v10 }
  0x42   :  { %684 = vmatprep.subr.bf16.mxu1 %v906_v0  ;;  %701 = vmatpush3.bf16.msra.mxu0 %v774_v17 }
  0x43   :  { %702 = vmatprep.subr.bf16.mxu0 %v906_v0 }
  0x45   :  { %685 = vmatpush3.bf16.msra.mxu1 %v768_v11 }
  0x46   :  { %710 = vmatprep.subr.bf16.mxu1 %v906_v0  ;;  %703 = vmatpush3.bf16.msra.mxu0 %v775_v30 }
  0x47   :  { %704 = vmatprep.subr.bf16.mxu0 %v906_v0 }
  0x4a   :  { %705 = vmatpush3.bf16.msra.mxu0 %v776_v31 }
  0x4b   :  { %730 = vmatprep.subr.bf16.mxu0 %v906_v0 }
  0xec   :  { %v109_v23 = vpop.f32.mrf.mxu0 }
  0xed   :  { %v110_v24 = vadd.f32 %v109_v23, %v64_v22 }
  0xee   :  { %v668_v25 = vpop.f32.mrf.mxu0 }
  0xef   :  { %v115_v26 = vmax.f32 %v110_v24, 0.0 }
  0xf0   :  { %v112_v27 = vpop.f32.mrf.mxu0 }
  0xf1   :  { %v132_v28 = vpack.c.bf16 %v115_v26, %v115_v26 }
  0xf2   :  { %v669_v29 = vpop.f32.mrf.mxu0 }
  0xf3   :  { %687 = vmatmul.mubr.bf16.vlgmr.msra.gmra.mxu1 %v132_v28 }
  0xf4   :  { %726 = vmatprep.mubr.msk.bf16.mxu1 %vm907_vm0, %v906_v0  ;;  %711 = vmatpush3.bf16.msra.mxu1 %v777_v32 }
  0xf5   :  { %712 = vmatprep.subr.bf16.mxu1 %v906_v0 }
  0xf8   :  { %713 = vmatpush3.bf16.msra.mxu1 %v778_v33 }
  0xf9   :  { %714 = vmatprep.subr.bf16.mxu1 %v906_v0 }
  0xfc   :  { %715 = vmatpush3.bf16.msra.mxu1 %v779_v34 }
  0xfd   :  { %716 = vmatprep.subr.bf16.mxu1 %v906_v0 }
 0x100   :  { %717 = vmatpush3.bf16.msra.mxu1 %v780_v35 }
 0x101   :  { %718 = vmatprep.subr.bf16.mxu1 %v906_v0 }
 0x104   :  { %719 = vmatpush3.bf16.msra.mxu1 %v781_v36 }
 0x105   :  { %720 = vmatprep.subr.bf16.mxu1 %v906_v0 }
 0x108   :  { %721 = vmatpush3.bf16.msra.mxu1 %v782_v37 }
 0x109   :  { %722 = vmatprep.subr.bf16.mxu1 %v906_v0 }
 0x10c   :  { %723 = vmatpush3.bf16.msra.mxu1 %v783_v47 }
 0x10d   :  { %724 = vmatprep.subr.bf16.mxu1 %v906_v0 }
 0x110   :  { %725 = vmatpush3.bf16.msra.mxu1 %v784_v48 }
 0x1b3   :  { %v219_v40 = vpop.f32.mrf.mxu1 }
 0x1b4   :  { %v220_v41 = vadd.f32 %v219_v40, %v136_v39 }
 0x1b5   :  { %v688_v42 = vpop.f32.mrf.mxu1 }
 0x1b6   :  { %v225_v43 = vmax.f32 %v220_v41, 0.0 }
 0x1b7   :  { %v222_v44 = vpop.f32.mrf.mxu1 }
 0x1b8   :  { %v242_v45 = vpack.c.bf16 %v225_v43, %v225_v43 }
 0x1b9   :  { %v689_v46 = vpop.f32.mrf.mxu1 }
 0x1ba   :  { %707 = vmatmul.mubr.bf16.vlgmr.msra.gmra.mxu0 %v242_v45 }
 0x1bb   :  { %746 = vmatprep.mubr.msk.bf16.mxu0 %vm907_vm0, %v906_v0  ;;  %731 = vmatpush3.bf16.msra.mxu0 %v785_v49 }
 0x1bc   :  { %732 = vmatprep.subr.bf16.mxu0 %v906_v0 }
 0x1bf   :  { %733 = vmatpush3.bf16.msra.mxu0 %v786_v50 }
 0x1c0   :  { %734 = vmatprep.subr.bf16.mxu0 %v906_v0 }
 0x1c3   :  { %735 = vmatpush3.bf16.msra.mxu0 %v787_v51 }
 0x1c4   :  { %736 = vmatprep.subr.bf16.mxu0 %v906_v0 }
 0x1c7   :  { %737 = vmatpush3.bf16.msra.mxu0 %v788_v52 }
 0x1c8   :  { %738 = vmatprep.subr.bf16.mxu0 %v906_v0 }
 0x1cb   :  { %739 = vmatpush3.bf16.msra.mxu0 %v789_v53 }
 0x1cc   :  { %740 = vmatprep.subr.bf16.mxu0 %v906_v0 }
 0x1cf   :  { %741 = vmatpush3.bf16.msra.mxu0 %v790_v54 }
 0x1d0   :  { %742 = vmatprep.subr.bf16.mxu0 %v906_v0 }
 0x1d3   :  { %743 = vmatpush3.bf16.msra.mxu0 %v791_v1 }
 0x1d4   :  { %744 = vmatprep.subr.bf16.mxu0 %v906_v0 }
 0x1d7   :  { %745 = vmatpush3.bf16.msra.mxu0 %v792_v2 }
 0x27a   :  { %v329_v57 = vpop.f32.mrf.mxu0 }
 0x27b   :  { %v330_v58 = vadd.f32 %v329_v57, %v246_v56 }
 0x27c   :  { %v708_v59 = vpop.f32.mrf.mxu0 }
 0x27d   :  { %v335_v60 = vmax.f32 %v330_v58, 0.0 }
 0x27e   :  { %v332_v61 = vpop.f32.mrf.mxu0 }
 0x27f   :  { %v352_v62 = vpack.c.bf16 %v335_v60, %v335_v60 }
 0x280   :  { %v709_v63 = vpop.f32.mrf.mxu0 }
 0x281   :  { %727 = vmatmul.mubr.bf16.vlgmr.msra.gmra.mxu1 %v352_v62 }
 0x341   :  { %v439_v5 = vpop.f32.mrf.mxu1 }
 0x342   :  { %v440_v6 = vadd.f32 %v439_v5, %v356_v4 }
 0x343   :  { %v728_v7 = vpop.f32.mrf.mxu1 }
 0x344   :  { %v445_v8 = vmax.f32 %v440_v6, 0.0 }
 0x345   :  { %v442_v9 = vpop.f32.mrf.mxu1 }
 0x346   :  { %v462_v10 = vpack.c.bf16 %v445_v8, %v445_v8 }
 0x347   :  { %v729_v11 = vpop.f32.mrf.mxu1 }
 0x348   :  { %747 = vmatmul.mubr.bf16.vlgmr.msra.gmra.mxu0 %v462_v10 }
 0x408   :  { %v549_v0 = vpop.f32.mrf.mxu0 }
 0x409   :  { %v550_v14 = vadd.f32 %v549_v0, %v466_v13 }
 0x40a   :  { %v748_v15 = vpop.f32.mrf.mxu0 }
 0x40b   :  { %558 = vrot.lane.b32.xlu0 %v550_v14, %s909_s5  ;;  %556 = vst.msk [vmem:[#allocation8] sm:$0x3] %vm555_vm2, %v550_v14 }
 0x40c   :  { %v552_v16 = vpop.f32.mrf.mxu0 }
 0x40d   :  { %864 = shalt.err (!%p861_p5)
}
 0x40e   :  { %571 = dma.vmem_to_hbm [thread:$0]  %s569_s2, 32, %s1013_s3, [#allocation4]   ;;  %v749_v17 = vpop.f32.mrf.mxu0 }
 0x40f   :  { %s910_s9 = smov [#allocation9]  }
 0x410   :  { %s578_s10 = sshll.u32 %s910_s9, 4  ;;  %s579_s10 = int_to_ptr.vmem [resolvable:$true] %s578_s10 }
 0x411   :  { %s873_s11 = scalar_lea.vmem %s579_s10, 32  ;;  %p878_p7 = scmp.lt.s32.totalorder %s579_s10, %s579_s10 }
 0x412   :  { %p874_p6 = scmp.ne.s32.totalorder %s579_s10, %s873_s11  ;;  %p879_p8 = scmp.lt.s32.totalorder %s873_s11, %s873_s11 }
 0x414   :  { %p880_p9 = por %p879_p8, %p878_p7 }
 0x416   :  { %p881_p10 = pnand %p880_p9, %p874_p6 }
 0x47d   :  { %v559_v18 = vpop.permute.xlu0 %558 }
 0x47e   :  { %561 = vst.msk [vmem:[#allocation9] sm:$0x3] %vm555_vm2, %v559_v18 }
 0x47f   :  { %884 = shalt.err (!%p881_p10)
}
 0x480   :  { %581 = dma.vmem_to_hbm [thread:$0]  %s579_s10, 32, %s1014_s4, [#allocation10]  }
 0x481   :  { %897 = dma.done.wait [#allocation4], 32  }
 0x482   :  { %898 = vsyncadd [#allocation4], 4294967264 }
 0x483   :  { %899 = dma.done.wait [#allocation10], 32  }
 0x484   :  { %900 = vsyncadd [#allocation10], 4294967264 }
 0x485   :  { %588 = vsyncpa [#allocation3], 1 }
 0x486   :  { %589 = vsyncpa [#allocation6], 1 }
 0x487   :  { %590 = vsyncpa [#allocation4], 1 }
 0x488   :  { %591 = vsyncpa [#allocation10], 1 }

</bundles_post_ra>
